<compile_context>
chip_gen: v5e
topology: v5e:2x2
jax: 0.10.0
libtpu: 0.0.40
codegen_flags: <defaults>
</compile_context>

<pallas_src>
import math
from functools import partial, lru_cache

import jax
import jax.numpy as jnp
from jax.experimental import pallas as pl
from jax.experimental.pallas import tpu as pltpu

_LANE = 128
_FALLBACK_TILE_BYTES = 2 * 1024 * 1024     # per-step x-tile target (v7x / unknown)
_FALLBACK_VMEM_LIMIT = 32 * 1024 * 1024    # scoped-VMEM budget (v7x / unknown)
_DEFAULT_MIN_PALLAS_BYTES = 256 * 1024     # below this a fused XLA add wins


# ----------------------------------------------------------------------------- kernel


def _pe_add_kernel(x_ref, pe_ref, o_ref):
    # Pure VPU elementwise add; pe block broadcasts over the leading (batch) dim.
    o_ref[...] = x_ref[...] + pe_ref[...]


# ----------------------------------------------------------------------------- PE table


def make_positional_encoding(d_model: int, max_len: int = 5000) -> jnp.ndarray:
    """Build the PE buffer exactly as the PyTorch module's __init__ does."""
    position = jnp.arange(max_len, dtype=jnp.float32)[:, None]                 # (max_len, 1)
    div_term = jnp.exp(
        jnp.arange(0, d_model, 2, dtype=jnp.float32) * (-math.log(10000.0) / d_model)
    )                                                                          # (ceil(D/2),)
    angles = position * div_term                                               # (max_len, ceil(D/2))
    pe = jnp.zeros((max_len, d_model), dtype=jnp.float32)
    pe = pe.at[:, 0::2].set(jnp.sin(angles))
    if d_model % 2 == 1:
        pe = pe.at[:, 1::2].set(jnp.cos(position * div_term[:-1]))
    else:
        pe = pe.at[:, 1::2].set(jnp.cos(angles))
    return pe                                                                  # (max_len, d_model)


# ----------------------------------------------------------------------------- budgets


@lru_cache(maxsize=1)
def _detected_vmem_bytes():
    try:
        info = pltpu.get_tpu_info()
    except Exception:
        return None
    for name in ("vmem_capacity_bytes", "vmem_size_bytes", "vmem_bytes"):
        v = getattr(info, name, None)
        if isinstance(v, int) and v > 0:
            return v
    return None


def _resolve_budgets(tile_bytes, vmem_limit_bytes):
    vmem = _detected_vmem_bytes()
    if vmem is not None and vmem >= 96 * 1024 * 1024:
        # v5e / v6e: 128 MiB physical VMEM -> bigger tiles amortize per-step overhead.
        auto_tile, auto_limit = 4 * 1024 * 1024, 64 * 1024 * 1024
    else:
        # v7x (64 MiB physical VMEM) or unknown hardware: stay conservative.
        auto_tile, auto_limit = _FALLBACK_TILE_BYTES, _FALLBACK_VMEM_LIMIT
    return (tile_bytes if tile_bytes is not None else auto_tile,
            vmem_limit_bytes if vmem_limit_bytes is not None else auto_limit)


def _choose_rows(T: int, itemsize: int, tile_bytes: int, vmem_limit: int) -> int:
    """Rows per (rows, 128) tile for the dense path (multiple of 8 or full T)."""
    budget = tile_bytes // max(1, _LANE * itemsize)
    # x, out and pe blocks are all (rows,128) and double-buffered -> 6*rows*128*itemsize.
    vmem_rows = (vmem_limit // 2) // max(1, 6 * _LANE * itemsize)
    rows = max(8, min(budget, vmem_rows))
    if T < 16:
        return T                                    # single full-extent block
    cap = max(8, (pl.cdiv(T, 2) // 8) * 8)          # >=2 grid steps (v7x megacore)
    rows = min(rows, cap)
    return max(8, (rows // 8) * 8)


def _choose_flat_tile(L: int, B: int, itemsize: int, tile_bytes: int, vmem_limit: int) -> int:
    """Lane tile for the ragged (B, L) fallback; multiple of 128 or full L.

    VMEM math uses the *sublane-padded* batch: a (B, tile) block occupies
    ceil(B/8)*8 sublanes and the (1, tile) pe block occupies 8.
    """
    padded_B = 8 * pl.cdiv(B, 8)
    per_lane_bytes = itemsize * (4 * padded_B + 2 * 8)    # 2x-buffered x + out + pe
    t_budget = tile_bytes // max(1, padded_B * itemsize)
    t_vmem = (vmem_limit // 2) // max(1, per_lane_bytes)
    max_elems = max(_LANE, min(t_budget, t_vmem))
    if L <= max_elems and L <= 2 * _LANE:
        return L                                          # tiny: one full-extent block
    cap = max(_LANE, (pl.cdiv(L, 2) // _LANE) * _LANE)    # >=2 grid steps when possible
    tile = min(max_elems, cap)
    return max(_LANE, (tile // _LANE) * _LANE)


# ----------------------------------------------------------------------------- core add


def _add_pe_slab(x, pe_slab, tile_bytes: int, vmem_limit: int):
    """out[b, s, d] = x[b, s, d] + pe_slab[s, d] via Pallas.  pe_slab is (S, D) in x.dtype."""
    B, S, D = x.shape
    L = S * D
    itemsize = jnp.dtype(x.dtype).itemsize

    if L % _LANE == 0:
        # Dense path: full (8,128)-tiled vregs regardless of batch size.
        T = L // _LANE
        rows = _choose_rows(T, itemsize, tile_bytes, vmem_limit)
        x3 = x.reshape(B, T, _LANE)
        pe3 = pe_slab.reshape(T, _LANE)
        out = pl.pallas_call(
            _pe_add_kernel,
            out_shape=jax.ShapeDtypeStruct((B, T, _LANE), x.dtype),
            grid_spec=pltpu.PrefetchScalarGridSpec(
                num_scalar_prefetch=0,
                grid=(pl.cdiv(T, rows), B),               # batch inner: pe DMA'd once per t-tile
                in_specs=[
                    pl.BlockSpec((1, rows, _LANE), lambda t, b: (b, t, 0)),
                    pl.BlockSpec((rows, _LANE), lambda t, b: (t, 0)),
                ],
                out_specs=pl.BlockSpec((1, rows, _LANE), lambda t, b: (b, t, 0)),
            ),
            compiler_params=pltpu.CompilerParams(
                dimension_semantics=("parallel", "arbitrary"),
                vmem_limit_bytes=vmem_limit,
            ),
        )(x3, pe3)
        return out.reshape(B, S, D)

    # Ragged fallback: lane-dense flattened (B, L) view, padded-B-aware tiles.
    tile = _choose_flat_tile(L, B, itemsize, tile_bytes, vmem_limit)
    x2 = x.reshape(B, L)
    pe2 = pe_slab.reshape(1, L)
    out = pl.pallas_call(
        _pe_add_kernel,
        out_shape=jax.ShapeDtypeStruct((B, L), x.dtype),
        grid_spec=pltpu.PrefetchScalarGridSpec(
            num_scalar_prefetch=0,
            grid=(pl.cdiv(L, tile),),
            in_specs=[
                pl.BlockSpec((B, tile), lambda t: (0, t)),
                pl.BlockSpec((1, tile), lambda t: (0, t)),
            ],
            out_specs=pl.BlockSpec((B, tile), lambda t: (0, t)),
        ),
        compiler_params=pltpu.CompilerParams(
            dimension_semantics=("parallel",),
            vmem_limit_bytes=vmem_limit,
        ),
    )(x2, pe2)
    return out.reshape(B, S, D)


# ----------------------------------------------------------------------------- forward


@partial(jax.jit, static_argnames=("pos_encoder_type", "tile_bytes",
                                   "vmem_limit_bytes", "min_pallas_bytes"))
def positional_encoding_forward(x: jnp.ndarray, pe: jnp.ndarray, *,
                                pos_encoder_type: str = "Original",
                                tile_bytes: int = None,
                                vmem_limit_bytes: int = None,
                                min_pallas_bytes: int = _DEFAULT_MIN_PALLAS_BYTES) -> jnp.ndarray:
    """x: [B, S, D].  pe: [max_len, D].  Returns x + positional encoding (eval-mode dropout).

    Note: the add writes a fresh output buffer (no input/output aliasing); callers
    wanting a true in-place update should donate x into jit and re-add the alias.
    """
    B, S, D = x.shape
    max_len = pe.shape[0]
    itemsize = jnp.dtype(x.dtype).itemsize
    tb, vl = _resolve_budgets(tile_bytes, vmem_limit_bytes)

    try:
        ptype = pos_encoder_type.lower()
    except Exception:
        ptype = "original"   # torch module's except-branch falls back to the original encoding

    if ptype == "mlhc":
        if S >= max_len:
            raise ValueError(f"mlhc positional encoding needs seq_len < max_len ({S} >= {max_len})")
        pe_c = pe if pe.dtype == x.dtype else pe.astype(x.dtype)
        pe_slab = jnp.broadcast_to(pe_c[S][None, :], (S, D))     # tiny (S*D) slab
    elif ptype == "original":
        if S > max_len:
            raise ValueError(f"seq_len {S} exceeds positional-encoding max_len {max_len}")
        pe_c = pe if pe.dtype == x.dtype else pe.astype(x.dtype)
        pe_slab = pe_c[:S, :]
    else:
        # Unknown type string -> neither torch branch runs; x passes through unchanged.
        return x

    if B * S * D * itemsize < min_pallas_bytes:
        # Toy sizes: pallas_call launch + per-step overhead dwarfs the work.
        return x + pe_slab[None, :, :]

    return _add_pe_slab(x, pe_slab, tb, vl)


# ----------------------------------------------------------------------------- smoke test


if __name__ == "__main__":
    max_len = 64
    B, S, D = 2, 8, 32

    key = jax.random.PRNGKey(0)
    x = jax.random.normal(key, (B, S, D), dtype=jnp.float32)
    pe = make_positional_encoding(D, max_len=max_len)

    ref_orig = x + pe[None, :S, :]
    ref_mlhc = x + pe[S][None, None, :]

    # min_pallas_bytes=0 forces the Pallas path even at these tiny shapes.
    y = jax.block_until_ready(
        positional_encoding_forward(x, pe, pos_encoder_type="Original", min_pallas_bytes=0))
    assert y.shape == (B, S, D)
    assert jnp.allclose(y, ref_orig, atol=1e-6), "Original path mismatch vs reference"

    y2 = jax.block_until_ready(
        positional_encoding_forward(x, pe, pos_encoder_type="mlhc", min_pallas_bytes=0))
    assert y2.shape == (B, S, D)
    assert jnp.allclose(y2, ref_mlhc, atol=1e-6), "mlhc path mismatch vs reference"

    # Dense multi-tile path (L % 128 == 0, T >= 16): grid = (2, B), parallel + arbitrary.
    B3, S3, D3 = 2, 64, 32
    x3 = jax.random.normal(jax.random.PRNGKey(2), (B3, S3, D3), dtype=jnp.float32)
    pe3 = make_positional_encoding(D3, max_len=128)
    ref3 = x3 + pe3[None, :S3, :]
    y3 = jax.block_until_ready(
        positional_encoding_forward(x3, pe3, pos_encoder_type="Original", min_pallas_bytes=0))
    assert jnp.allclose(y3, ref3, atol=1e-6), "dense multi-tile path mismatch vs reference"

    # Ragged fallback: odd d_model, L % 128 != 0, forced multi-tile grid.
    B4, S4, D4 = 3, 10, 33
    x4 = jax.random.normal(jax.random.PRNGKey(1), (B4, S4, D4), dtype=jnp.float32)
    pe4 = make_positional_encoding(D4, max_len=max_len)
    ref4 = x4 + pe4[None, :S4, :]
    y4 = jax.block_until_ready(
        positional_encoding_forward(x4, pe4, pos_encoder_type="Original",
                                    tile_bytes=4096, min_pallas_bytes=0))
    assert jnp.allclose(y4, ref4, atol=1e-6), "ragged fallback path mismatch vs reference"

    print("KERNEL_OK")
</pallas_src>

<mosaic_0001>
module attributes {stable_mosaic.version = 11 : i64} {
  func.func @_pe_add_kernel(%arg0: i32, %arg1: i32, %arg2: memref<1x2x128xf32, #tpu.memory_space<vmem>>, %arg3: memref<2x128xf32, #tpu.memory_space<vmem>>, %arg4: memref<1x2x128xf32, #tpu.memory_space<vmem>>) attributes {dimension_semantics = [#tpu.dimension_semantics<parallel>, #tpu.dimension_semantics<arbitrary>], iteration_bounds = array<i64: 1, 2>, scalar_prefetch = 0 : i64, scratch_operands = 0 : i64, tpu.core_type = #tpu.core_type<tc>, window_params = [{transform_indices = @transform_0, window_bounds = array<i64: 1, 2, 128>}, {transform_indices = @transform_1, window_bounds = array<i64: 2, 128>}, {transform_indices = @transform_2, window_bounds = array<i64: 1, 2, 128>}]} {
    %c0 = arith.constant 0 : index
    %c0_0 = arith.constant 0 : index
    %c0_1 = arith.constant 0 : index
    %0 = vector.load %arg2[%c0, %c0_0, %c0_1] : memref<1x2x128xf32, #tpu.memory_space<vmem>>, vector<1x2x128xf32>
    %c0_2 = arith.constant 0 : index
    %c0_3 = arith.constant 0 : index
    %1 = vector.load %arg3[%c0_2, %c0_3] : memref<2x128xf32, #tpu.memory_space<vmem>>, vector<2x128xf32>
    %2 = vector.shape_cast %1 : vector<2x128xf32> to vector<1x2x128xf32>
    %3 = arith.addf %0, %2 : vector<1x2x128xf32>
    %c0_4 = arith.constant 0 : index
    %c0_5 = arith.constant 0 : index
    %c0_6 = arith.constant 0 : index
    %4 = vector.load %arg4[%c0_4, %c0_5, %c0_6] : memref<1x2x128xf32, #tpu.memory_space<vmem>>, vector<1x2x128xf32>
    tpu.vector_store %arg4[%c0_4, %c0_5, %c0_6], %3 {strides = array<i32>} : memref<1x2x128xf32, #tpu.memory_space<vmem>>, vector<1x2x128xf32>,
    return
  }
  func.func @transform_0(%arg0: i32, %arg1: i32) -> (i32, i32, i32) {
    %c0_i32 = arith.constant 0 : i32
    %c0_i32_0 = arith.constant 0 : i32
    return %arg1, %arg0, %c0_i32 : i32, i32, i32
  }
  func.func @transform_1(%arg0: i32, %arg1: i32) -> (i32, i32) {
    %c0_i32 = arith.constant 0 : i32
    %c0_i32_0 = arith.constant 0 : i32
    return %arg0, %c0_i32 : i32, i32
  }
  func.func @transform_2(%arg0: i32, %arg1: i32) -> (i32, i32, i32) {
    %c0_i32 = arith.constant 0 : i32
    %c0_i32_0 = arith.constant 0 : i32
    return %arg1, %arg0, %c0_i32 : i32, i32, i32
  }
}

</mosaic_0001>

<bundles_post_ra>
// kernel: positional_encoding_forward.1
= control target key start
LH: loop header
LB: loop body
LE: loop exit
PB: predicated region body
PF: predicated region fallthrough
CT: control target
= control target key end

     0   :  { %s354_s9 = smov 0   ;;  %s331_s10 = smov 0   ;;  %s368_s0 = inlined_call_operand.vmem [shape: f32[2,2,128], index: 0, kind: input, shape index: {}]   ;;  %s369_s1 = inlined_call_operand.vmem [shape: f32[2,128], index: 1, kind: input, shape index: {}]   ;;  %s370_s2 = inlined_call_operand.vmem [shape: f32[2,2,128], index: 2, kind: output, shape index: {}]  }
   0x1   :  { %s335_s11 = smov 0  }
   0x2 LB: > { %s21_s12 = sadd.s32 1, %s333_s10  ;;  %p286_p0 = scmp.ge.s32.totalorder %s337_s11, 1  ;;  %s337_s11 = sphi %s335_s11, %s12_s11   ;;  %s333_s10 = sphi %s331_s10, %s332_s10   ;;  %s329_s9 = sphi %s354_s9, %s371_s9  }
   0x3   : > { %p22_p1 = scmp.ge.s32.totalorder %s21_s12, 2  ;;  %p139_p2 = scmp.lt.s32.totalorder %s337_s11, 3 }
   0x5   : > { %s373_s12 = smov (%p22_p1, %s21_s12), 0  ;;  %p140_p3 = pnand %p286_p0, %p139_p2 }
   0x6   : > { %p169_p4 = scmp.lt.s32.totalorder (!%p140_p3), %s329_s9, 1 }
   0x7   : > { %143 = sbr.rel (%p140_p3) target bundleno = 19 (0x13), region = 28 }
   0xc   : > { %s375_s9 = smov (!%p169_p4, %s329_s9), 1  ;;  %v188_v0 = vld [vmem:[%s369_s1] sm:$0x3] }
   0xd   : > { %s287_s13 = sshll.u32 %s375_s9, 1 }
   0xe   : > { %s175_s18 = scalar_lea.vmem %s368_s0, %s287_s13  ;;  %s186_s21 = scalar_lea.vmem %s370_s2, %s287_s13 }
   0xf   : > { %v187_v1 = vld [vmem:[%s175_s18] sm:$0x3] }
  0x10   : > { %v189_v2 = vadd.f32 %v188_v0, %v187_v1 }
  0x12   : > { %190 = vst [vmem:[%s186_s21] sm:$0x3] %v189_v2 }
  0x13 PF: > { %s12_s11 = sadd.s32 1, %s337_s11   ;;  %s371_s9 = smov %s333_s10 }
  0x14   : > { %p9_p5 = scmp.ge.s32.totalorder %s12_s11, 4   ;;  %s332_s10 = smov %s373_s12  }
  0x16   :  { %11 = sbr.rel (!%p9_p5) target bundleno = 2 (0x2), region = 61 }

</bundles_post_ra>
